<compile_context>
chip_gen: v6e
topology: v6e:2x2x1
jax: 0.10.0
libtpu: 0.0.40
codegen_flags: <defaults>
</compile_context>

<pallas_src>
import jax
import jax.numpy as jnp
from jax.experimental import pallas as pl
from jax.experimental.pallas import tpu as pltpu


def lstm_tagger_kernel(
    emb_ref,    # (T, E)   bf16 embedded sentence
    wih_ref,    # (E, 4H)  bf16 input->gates weight (transposed, gate order i,f,g,o)
    whh_ref,    # (H, 4H)  f32  hidden->gates weight (transposed)
    b_ref,      # (1, 4H)  f32  bias_ih + bias_hh
    wtag_ref,   # (H, TAG) bf16 hidden2tag weight (transposed)
    btag_ref,   # (1, TAG) f32  hidden2tag bias
    out_ref,    # (T, TAG) f32  log-softmax tag scores
    hs_ref,     # scratch (T, H) f32 all hidden states
):
    T = emb_ref.shape[0]
    H = whh_ref.shape[0]

    # Input contributions for all timesteps in one MXU matmul (bf16 in, f32 acc).
    xg = (
        jnp.dot(emb_ref[...], wih_ref[...], preferred_element_type=jnp.float32)
        + b_ref[...]
    )                                                     # (T, 4H) f32, in vregs

    # Hoist the recurrent weight load out of the loop (stays resident).
    whh = whh_ref[...]                                    # (H, 4H) f32

    # h0 = c0 = 0 (PyTorch nn.LSTM default). Fully unrolled recurrence:
    # h/c live in vregs, all slices/stores use static indices.
    h = jnp.zeros((1, H), jnp.float32)
    c = jnp.zeros((1, H), jnp.float32)
    for t in range(T):
        gates = xg[t:t + 1, :] + jnp.dot(
            h, whh, preferred_element_type=jnp.float32
        )                                                 # (1, 4H)
        i_g = jax.nn.sigmoid(gates[:, 0 * H:1 * H])
        f_g = jax.nn.sigmoid(gates[:, 1 * H:2 * H])
        g_g = jnp.tanh(gates[:, 2 * H:3 * H])
        o_g = jax.nn.sigmoid(gates[:, 3 * H:4 * H])
        c = f_g * c + i_g * g_g
        h = o_g * jnp.tanh(c)
        hs_ref[pl.ds(t, 1), :] = h                        # off the critical chain

    # hidden2tag linear (bf16 in, f32 acc) + stable log_softmax over last axis.
    tag_space = (
        jnp.dot(
            hs_ref[...].astype(wtag_ref.dtype),
            wtag_ref[...],
            preferred_element_type=jnp.float32,
        )
        + btag_ref[...]
    )                                                     # (T, TAG)
    m = jnp.max(tag_space, axis=-1, keepdims=True)
    z = tag_space - m
    lse = jnp.log(jnp.sum(jnp.exp(z), axis=-1, keepdims=True))
    out_ref[...] = z - lse


def lstm_tagger_forward(sentence, emb_table, w_ih, w_hh, b_ih, b_hh, w_tag, b_tag):
    """sentence: (T,) int32; returns (T, TAG) f32 log-softmax tag scores."""
    T = sentence.shape[0]
    H = w_hh.shape[1]
    TAG = w_tag.shape[0]

    # Glue: embedding gather + weight transposes / bias fusion.
    # bf16 on the throughput matmul operands; recurrence weight/bias stay f32.
    embeds = emb_table[sentence].astype(jnp.bfloat16)               # (T, E)
    wih_t = w_ih.T.astype(jnp.bfloat16)                             # (E, 4H)
    whh_t = w_hh.T.astype(jnp.float32)                              # (H, 4H)
    bias = (b_ih + b_hh).reshape(1, 4 * H).astype(jnp.float32)      # (1, 4H)
    wtag_t = w_tag.T.astype(jnp.bfloat16)                           # (H, TAG)
    btag = b_tag.reshape(1, TAG).astype(jnp.float32)                # (1, TAG)

    vmem = pltpu.MemorySpace.VMEM
    return pl.pallas_call(
        lstm_tagger_kernel,
        out_shape=jax.ShapeDtypeStruct((T, TAG), jnp.float32),
        in_specs=[pl.BlockSpec(memory_space=vmem)] * 6,
        out_specs=pl.BlockSpec(memory_space=vmem),
        scratch_shapes=[pltpu.VMEM((T, H), jnp.float32)],
    )(embeds, wih_t, whh_t, bias, wtag_t, btag)


def _reference(sentence, emb_table, w_ih, w_hh, b_ih, b_hh, w_tag, b_tag):
    """Pure-JAX reference matching torch.nn.LSTM semantics (gate order i,f,g,o),
    with the same bf16 quantization the kernel applies (weights of the two
    throughput matmuls + embeddings + hs), so the comparison is apples-to-apples."""
    def q(x):
        return x.astype(jnp.bfloat16).astype(jnp.float32)

    embeds = q(emb_table[sentence])
    wih = q(w_ih)
    wtag = q(w_tag)
    H = w_hh.shape[1]
    h = jnp.zeros((H,), jnp.float32)
    c = jnp.zeros((H,), jnp.float32)
    hs = []
    for t in range(sentence.shape[0]):
        gates = wih @ embeds[t] + b_ih + b_hh + w_hh @ h
        i = jax.nn.sigmoid(gates[0 * H:1 * H])
        f = jax.nn.sigmoid(gates[1 * H:2 * H])
        g = jnp.tanh(gates[2 * H:3 * H])
        o = jax.nn.sigmoid(gates[3 * H:4 * H])
        c = f * c + i * g
        h = o * jnp.tanh(c)
        hs.append(h)
    hs = jnp.stack(hs)                                    # (T, H)
    tag_space = q(hs) @ wtag.T + b_tag
    return jax.nn.log_softmax(tag_space, axis=1)


if __name__ == "__main__":
    # Small shapes consistent with the module.
    EMBEDDING_DIM = 32
    HIDDEN_DIM = 32
    VOCAB_SIZE = 16
    TAGSET_SIZE = 8
    SEQ_LEN = 8

    key = jax.random.PRNGKey(0)
    ks = jax.random.split(key, 8)
    bound = 1.0 / (HIDDEN_DIM ** 0.5)

    emb_table = jax.random.normal(ks[0], (VOCAB_SIZE, EMBEDDING_DIM), jnp.float32)
    w_ih = jax.random.uniform(ks[1], (4 * HIDDEN_DIM, EMBEDDING_DIM), jnp.float32, -bound, bound)
    w_hh = jax.random.uniform(ks[2], (4 * HIDDEN_DIM, HIDDEN_DIM), jnp.float32, -bound, bound)
    b_ih = jax.random.uniform(ks[3], (4 * HIDDEN_DIM,), jnp.float32, -bound, bound)
    b_hh = jax.random.uniform(ks[4], (4 * HIDDEN_DIM,), jnp.float32, -bound, bound)
    w_tag = jax.random.uniform(ks[5], (TAGSET_SIZE, HIDDEN_DIM), jnp.float32, -bound, bound)
    b_tag = jax.random.uniform(ks[6], (TAGSET_SIZE,), jnp.float32, -bound, bound)

    sentence = jax.random.randint(ks[7], (SEQ_LEN,), 0, VOCAB_SIZE, jnp.int32)

    out = lstm_tagger_forward(
        sentence, emb_table, w_ih, w_hh, b_ih, b_hh, w_tag, b_tag
    )
    out = jax.block_until_ready(out)

    ref = _reference(sentence, emb_table, w_ih, w_hh, b_ih, b_hh, w_tag, b_tag)
    assert out.shape == (SEQ_LEN, TAGSET_SIZE)
    assert jnp.allclose(out, ref, atol=1e-3, rtol=1e-3), "mismatch vs reference"

    print("KERNEL_OK")
</pallas_src>

<mosaic_0001>
module attributes {stable_mosaic.version = 11 : i64} {
  func.func @lstm_tagger_kernel(%arg0: memref<8x32xbf16, #tpu.memory_space<vmem>>, %arg1: memref<32x128xbf16, #tpu.memory_space<vmem>>, %arg2: memref<32x128xf32, #tpu.memory_space<vmem>>, %arg3: memref<1x128xf32, #tpu.memory_space<vmem>>, %arg4: memref<32x8xbf16, #tpu.memory_space<vmem>>, %arg5: memref<1x8xf32, #tpu.memory_space<vmem>>, %arg6: memref<8x8xf32, #tpu.memory_space<vmem>>, %arg7: memref<8x32xf32, #tpu.memory_space<vmem>>) attributes {dimension_semantics = [], scalar_prefetch = 0 : i64, scratch_operands = 1 : i64, tpu.core_type = #tpu.core_type<tc>} {
    %c0 = arith.constant 0 : index
    %c0_0 = arith.constant 0 : index
    %0 = vector.load %arg0[%c0, %c0_0] : memref<8x32xbf16, #tpu.memory_space<vmem>>, vector<8x32xbf16>
    %c0_1 = arith.constant 0 : index
    %c0_2 = arith.constant 0 : index
    %1 = vector.load %arg1[%c0_1, %c0_2] : memref<32x128xbf16, #tpu.memory_space<vmem>>, vector<32x128xbf16>
    %cst = arith.constant dense<0.000000e+00> : vector<8x128xf32>
    %2 = tpu.matmul %0, %1, %cst {dimension_numbers = #tpu.dot_dimension_numbers<[1], [0], [0], [1], [0, 0, 1, 1], [], []>} : vector<8x32xbf16>, vector<32x128xbf16>, vector<8x128xf32> -> vector<8x128xf32>
    %c0_3 = arith.constant 0 : index
    %c0_4 = arith.constant 0 : index
    %3 = vector.load %arg3[%c0_3, %c0_4] : memref<1x128xf32, #tpu.memory_space<vmem>>, vector<1x128xf32>
    %4 = vector.broadcast %3 : vector<1x128xf32> to vector<8x128xf32>
    %5 = arith.addf %2, %4 : vector<8x128xf32>
    %c0_5 = arith.constant 0 : index
    %c0_6 = arith.constant 0 : index
    %6 = vector.load %arg2[%c0_5, %c0_6] : memref<32x128xf32, #tpu.memory_space<vmem>>, vector<32x128xf32>
    %cst_7 = arith.constant 0.000000e+00 : f32
    %7 = vector.broadcast %cst_7 : f32 to vector<1x32xf32>
    %cst_8 = arith.constant 0.000000e+00 : f32
    %8 = vector.broadcast %cst_8 : f32 to vector<1x32xf32>
    %9 = vector.extract_strided_slice %5 {offsets = [0, 0], sizes = [1, 128], strides = [1, 1]} : vector<8x128xf32> to vector<1x128xf32>
    %cst_9 = arith.constant dense<0.000000e+00> : vector<1x128xf32>
    %10 = tpu.matmul %7, %6, %cst_9 {dimension_numbers = #tpu.dot_dimension_numbers<[1], [0], [0], [1], [0, 0, 1, 1], [], []>} : vector<1x32xf32>, vector<32x128xf32>, vector<1x128xf32> -> vector<1x128xf32>
    %11 = arith.addf %9, %10 : vector<1x128xf32>
    %12 = vector.extract_strided_slice %11 {offsets = [0, 0], sizes = [1, 32], strides = [1, 1]} : vector<1x128xf32> to vector<1x32xf32>
    %13 = arith.negf %12 : vector<1x32xf32>
    %14 = math.exp %13 : vector<1x32xf32>
    %cst_10 = arith.constant 1.000000e+00 : f32
    %15 = vector.broadcast %cst_10 : f32 to vector<1x32xf32>
    %16 = arith.addf %15, %14 : vector<1x32xf32>
    %17 = arith.divf %15, %16 : vector<1x32xf32>
    %18 = vector.extract_strided_slice %11 {offsets = [0, 32], sizes = [1, 32], strides = [1, 1]} : vector<1x128xf32> to vector<1x32xf32>
    %19 = arith.negf %18 : vector<1x32xf32>
    %20 = math.exp %19 : vector<1x32xf32>
    %cst_11 = arith.constant 1.000000e+00 : f32
    %21 = vector.broadcast %cst_11 : f32 to vector<1x32xf32>
    %22 = arith.addf %21, %20 : vector<1x32xf32>
    %23 = arith.divf %21, %22 : vector<1x32xf32>
    %24 = vector.extract_strided_slice %11 {offsets = [0, 64], sizes = [1, 32], strides = [1, 1]} : vector<1x128xf32> to vector<1x32xf32>
    %25 = math.tanh %24 : vector<1x32xf32>
    %26 = vector.extract_strided_slice %11 {offsets = [0, 96], sizes = [1, 32], strides = [1, 1]} : vector<1x128xf32> to vector<1x32xf32>
    %27 = arith.negf %26 : vector<1x32xf32>
    %28 = math.exp %27 : vector<1x32xf32>
    %cst_12 = arith.constant 1.000000e+00 : f32
    %29 = vector.broadcast %cst_12 : f32 to vector<1x32xf32>
    %30 = arith.addf %29, %28 : vector<1x32xf32>
    %31 = arith.divf %29, %30 : vector<1x32xf32>
    %32 = arith.mulf %23, %8 : vector<1x32xf32>
    %33 = arith.mulf %17, %25 : vector<1x32xf32>
    %34 = arith.addf %32, %33 : vector<1x32xf32>
    %35 = math.tanh %34 : vector<1x32xf32>
    %36 = arith.mulf %31, %35 : vector<1x32xf32>
    %c0_13 = arith.constant 0 : index
    %c0_14 = arith.constant 0 : index
    %37 = vector.load %arg7[%c0_13, %c0_14] : memref<8x32xf32, #tpu.memory_space<vmem>>, vector<1x32xf32>
    tpu.vector_store %arg7[%c0_13, %c0_14], %36 {strides = array<i32>} : memref<8x32xf32, #tpu.memory_space<vmem>>, vector<1x32xf32>,
    %38 = vector.extract_strided_slice %5 {offsets = [1, 0], sizes = [1, 128], strides = [1, 1]} : vector<8x128xf32> to vector<1x128xf32>
    %cst_15 = arith.constant dense<0.000000e+00> : vector<1x128xf32>
    %39 = tpu.matmul %36, %6, %cst_15 {dimension_numbers = #tpu.dot_dimension_numbers<[1], [0], [0], [1], [0, 0, 1, 1], [], []>} : vector<1x32xf32>, vector<32x128xf32>, vector<1x128xf32> -> vector<1x128xf32>
    %40 = arith.addf %38, %39 : vector<1x128xf32>
    %41 = vector.extract_strided_slice %40 {offsets = [0, 0], sizes = [1, 32], strides = [1, 1]} : vector<1x128xf32> to vector<1x32xf32>
    %42 = arith.negf %41 : vector<1x32xf32>
    %43 = math.exp %42 : vector<1x32xf32>
    %cst_16 = arith.constant 1.000000e+00 : f32
    %44 = vector.broadcast %cst_16 : f32 to vector<1x32xf32>
    %45 = arith.addf %44, %43 : vector<1x32xf32>
    %46 = arith.divf %44, %45 : vector<1x32xf32>
    %47 = vector.extract_strided_slice %40 {offsets = [0, 32], sizes = [1, 32], strides = [1, 1]} : vector<1x128xf32> to vector<1x32xf32>
    %48 = arith.negf %47 : vector<1x32xf32>
    %49 = math.exp %48 : vector<1x32xf32>
    %cst_17 = arith.constant 1.000000e+00 : f32
    %50 = vector.broadcast %cst_17 : f32 to vector<1x32xf32>
    %51 = arith.addf %50, %49 : vector<1x32xf32>
    %52 = arith.divf %50, %51 : vector<1x32xf32>
    %53 = vector.extract_strided_slice %40 {offsets = [0, 64], sizes = [1, 32], strides = [1, 1]} : vector<1x128xf32> to vector<1x32xf32>
    %54 = math.tanh %53 : vector<1x32xf32>
    %55 = vector.extract_strided_slice %40 {offsets = [0, 96], sizes = [1, 32], strides = [1, 1]} : vector<1x128xf32> to vector<1x32xf32>
    %56 = arith.negf %55 : vector<1x32xf32>
    %57 = math.exp %56 : vector<1x32xf32>
    %cst_18 = arith.constant 1.000000e+00 : f32
    %58 = vector.broadcast %cst_18 : f32 to vector<1x32xf32>
    %59 = arith.addf %58, %57 : vector<1x32xf32>
    %60 = arith.divf %58, %59 : vector<1x32xf32>
    %61 = arith.mulf %52, %34 : vector<1x32xf32>
    %62 = arith.mulf %46, %54 : vector<1x32xf32>
    %63 = arith.addf %61, %62 : vector<1x32xf32>
    %64 = math.tanh %63 : vector<1x32xf32>
    %65 = arith.mulf %60, %64 : vector<1x32xf32>
    %c1 = arith.constant 1 : index
    %c0_19 = arith.constant 0 : index
    %66 = vector.load %arg7[%c1, %c0_19] : memref<8x32xf32, #tpu.memory_space<vmem>>, vector<1x32xf32>
    tpu.vector_store %arg7[%c1, %c0_19], %65 {strides = array<i32>} : memref<8x32xf32, #tpu.memory_space<vmem>>, vector<1x32xf32>,
    %67 = vector.extract_strided_slice %5 {offsets = [2, 0], sizes = [1, 128], strides = [1, 1]} : vector<8x128xf32> to vector<1x128xf32>
    %cst_20 = arith.constant dense<0.000000e+00> : vector<1x128xf32>
    %68 = tpu.matmul %65, %6, %cst_20 {dimension_numbers = #tpu.dot_dimension_numbers<[1], [0], [0], [1], [0, 0, 1, 1], [], []>} : vector<1x32xf32>, vector<32x128xf32>, vector<1x128xf32> -> vector<1x128xf32>
    %69 = arith.addf %67, %68 : vector<1x128xf32>
    %70 = vector.extract_strided_slice %69 {offsets = [0, 0], sizes = [1, 32], strides = [1, 1]} : vector<1x128xf32> to vector<1x32xf32>
    %71 = arith.negf %70 : vector<1x32xf32>
    %72 = math.exp %71 : vector<1x32xf32>
    %cst_21 = arith.constant 1.000000e+00 : f32
    %73 = vector.broadcast %cst_21 : f32 to vector<1x32xf32>
    %74 = arith.addf %73, %72 : vector<1x32xf32>
    %75 = arith.divf %73, %74 : vector<1x32xf32>
    %76 = vector.extract_strided_slice %69 {offsets = [0, 32], sizes = [1, 32], strides = [1, 1]} : vector<1x128xf32> to vector<1x32xf32>
    %77 = arith.negf %76 : vector<1x32xf32>
    %78 = math.exp %77 : vector<1x32xf32>
    %cst_22 = arith.constant 1.000000e+00 : f32
    %79 = vector.broadcast %cst_22 : f32 to vector<1x32xf32>
    %80 = arith.addf %79, %78 : vector<1x32xf32>
    %81 = arith.divf %79, %80 : vector<1x32xf32>
    %82 = vector.extract_strided_slice %69 {offsets = [0, 64], sizes = [1, 32], strides = [1, 1]} : vector<1x128xf32> to vector<1x32xf32>
    %83 = math.tanh %82 : vector<1x32xf32>
    %84 = vector.extract_strided_slice %69 {offsets = [0, 96], sizes = [1, 32], strides = [1, 1]} : vector<1x128xf32> to vector<1x32xf32>
    %85 = arith.negf %84 : vector<1x32xf32>
    %86 = math.exp %85 : vector<1x32xf32>
    %cst_23 = arith.constant 1.000000e+00 : f32
    %87 = vector.broadcast %cst_23 : f32 to vector<1x32xf32>
    %88 = arith.addf %87, %86 : vector<1x32xf32>
    %89 = arith.divf %87, %88 : vector<1x32xf32>
    %90 = arith.mulf %81, %63 : vector<1x32xf32>
    %91 = arith.mulf %75, %83 : vector<1x32xf32>
    %92 = arith.addf %90, %91 : vector<1x32xf32>
    %93 = math.tanh %92 : vector<1x32xf32>
    %94 = arith.mulf %89, %93 : vector<1x32xf32>
    %c2 = arith.constant 2 : index
    %c0_24 = arith.constant 0 : index
    %95 = vector.load %arg7[%c2, %c0_24] : memref<8x32xf32, #tpu.memory_space<vmem>>, vector<1x32xf32>
    tpu.vector_store %arg7[%c2, %c0_24], %94 {strides = array<i32>} : memref<8x32xf32, #tpu.memory_space<vmem>>, vector<1x32xf32>,
    %96 = vector.extract_strided_slice %5 {offsets = [3, 0], sizes = [1, 128], strides = [1, 1]} : vector<8x128xf32> to vector<1x128xf32>
    %cst_25 = arith.constant dense<0.000000e+00> : vector<1x128xf32>
    %97 = tpu.matmul %94, %6, %cst_25 {dimension_numbers = #tpu.dot_dimension_numbers<[1], [0], [0], [1], [0, 0, 1, 1], [], []>} : vector<1x32xf32>, vector<32x128xf32>, vector<1x128xf32> -> vector<1x128xf32>
    %98 = arith.addf %96, %97 : vector<1x128xf32>
    %99 = vector.extract_strided_slice %98 {offsets = [0, 0], sizes = [1, 32], strides = [1, 1]} : vector<1x128xf32> to vector<1x32xf32>
    %100 = arith.negf %99 : vector<1x32xf32>
    %101 = math.exp %100 : vector<1x32xf32>
    %cst_26 = arith.constant 1.000000e+00 : f32
    %102 = vector.broadcast %cst_26 : f32 to vector<1x32xf32>
    %103 = arith.addf %102, %101 : vector<1x32xf32>
    %104 = arith.divf %102, %103 : vector<1x32xf32>
    %105 = vector.extract_strided_slice %98 {offsets = [0, 32], sizes = [1, 32], strides = [1, 1]} : vector<1x128xf32> to vector<1x32xf32>
    %106 = arith.negf %105 : vector<1x32xf32>
    %107 = math.exp %106 : vector<1x32xf32>
    %cst_27 = arith.constant 1.000000e+00 : f32
    %108 = vector.broadcast %cst_27 : f32 to vector<1x32xf32>
    %109 = arith.addf %108, %107 : vector<1x32xf32>
    %110 = arith.divf %108, %109 : vector<1x32xf32>
    %111 = vector.extract_strided_slice %98 {offsets = [0, 64], sizes = [1, 32], strides = [1, 1]} : vector<1x128xf32> to vector<1x32xf32>
    %112 = math.tanh %111 : vector<1x32xf32>
    %113 = vector.extract_strided_slice %98 {offsets = [0, 96], sizes = [1, 32], strides = [1, 1]} : vector<1x128xf32> to vector<1x32xf32>
    %114 = arith.negf %113 : vector<1x32xf32>
    %115 = math.exp %114 : vector<1x32xf32>
    %cst_28 = arith.constant 1.000000e+00 : f32
    %116 = vector.broadcast %cst_28 : f32 to vector<1x32xf32>
    %117 = arith.addf %116, %115 : vector<1x32xf32>
    %118 = arith.divf %116, %117 : vector<1x32xf32>
    %119 = arith.mulf %110, %92 : vector<1x32xf32>
    %120 = arith.mulf %104, %112 : vector<1x32xf32>
    %121 = arith.addf %119, %120 : vector<1x32xf32>
    %122 = math.tanh %121 : vector<1x32xf32>
    %123 = arith.mulf %118, %122 : vector<1x32xf32>
    %c3 = arith.constant 3 : index
    %c0_29 = arith.constant 0 : index
    %124 = vector.load %arg7[%c3, %c0_29] : memref<8x32xf32, #tpu.memory_space<vmem>>, vector<1x32xf32>
    tpu.vector_store %arg7[%c3, %c0_29], %123 {strides = array<i32>} : memref<8x32xf32, #tpu.memory_space<vmem>>, vector<1x32xf32>,
    %125 = vector.extract_strided_slice %5 {offsets = [4, 0], sizes = [1, 128], strides = [1, 1]} : vector<8x128xf32> to vector<1x128xf32>
    %cst_30 = arith.constant dense<0.000000e+00> : vector<1x128xf32>
    %126 = tpu.matmul %123, %6, %cst_30 {dimension_numbers = #tpu.dot_dimension_numbers<[1], [0], [0], [1], [0, 0, 1, 1], [], []>} : vector<1x32xf32>, vector<32x128xf32>, vector<1x128xf32> -> vector<1x128xf32>
    %127 = arith.addf %125, %126 : vector<1x128xf32>
    %128 = vector.extract_strided_slice %127 {offsets = [0, 0], sizes = [1, 32], strides = [1, 1]} : vector<1x128xf32> to vector<1x32xf32>
    %129 = arith.negf %128 : vector<1x32xf32>
    %130 = math.exp %129 : vector<1x32xf32>
    %cst_31 = arith.constant 1.000000e+00 : f32
    %131 = vector.broadcast %cst_31 : f32 to vector<1x32xf32>
    %132 = arith.addf %131, %130 : vector<1x32xf32>
    %133 = arith.divf %131, %132 : vector<1x32xf32>
    %134 = vector.extract_strided_slice %127 {offsets = [0, 32], sizes = [1, 32], strides = [1, 1]} : vector<1x128xf32> to vector<1x32xf32>
    %135 = arith.negf %134 : vector<1x32xf32>
    %136 = math.exp %135 : vector<1x32xf32>
    %cst_32 = arith.constant 1.000000e+00 : f32
    %137 = vector.broadcast %cst_32 : f32 to vector<1x32xf32>
    %138 = arith.addf %137, %136 : vector<1x32xf32>
    %139 = arith.divf %137, %138 : vector<1x32xf32>
    %140 = vector.extract_strided_slice %127 {offsets = [0, 64], sizes = [1, 32], strides = [1, 1]} : vector<1x128xf32> to vector<1x32xf32>
    %141 = math.tanh %140 : vector<1x32xf32>
    %142 = vector.extract_strided_slice %127 {offsets = [0, 96], sizes = [1, 32], strides = [1, 1]} : vector<1x128xf32> to vector<1x32xf32>
    %143 = arith.negf %142 : vector<1x32xf32>
    %144 = math.exp %143 : vector<1x32xf32>
    %cst_33 = arith.constant 1.000000e+00 : f32
    %145 = vector.broadcast %cst_33 : f32 to vector<1x32xf32>
    %146 = arith.addf %145, %144 : vector<1x32xf32>
    %147 = arith.divf %145, %146 : vector<1x32xf32>
    %148 = arith.mulf %139, %121 : vector<1x32xf32>
    %149 = arith.mulf %133, %141 : vector<1x32xf32>
    %150 = arith.addf %148, %149 : vector<1x32xf32>
    %151 = math.tanh %150 : vector<1x32xf32>
    %152 = arith.mulf %147, %151 : vector<1x32xf32>
    %c4 = arith.constant 4 : index
    %c0_34 = arith.constant 0 : index
    %153 = vector.load %arg7[%c4, %c0_34] : memref<8x32xf32, #tpu.memory_space<vmem>>, vector<1x32xf32>
    tpu.vector_store %arg7[%c4, %c0_34], %152 {strides = array<i32>} : memref<8x32xf32, #tpu.memory_space<vmem>>, vector<1x32xf32>,
    %154 = vector.extract_strided_slice %5 {offsets = [5, 0], sizes = [1, 128], strides = [1, 1]} : vector<8x128xf32> to vector<1x128xf32>
    %cst_35 = arith.constant dense<0.000000e+00> : vector<1x128xf32>
    %155 = tpu.matmul %152, %6, %cst_35 {dimension_numbers = #tpu.dot_dimension_numbers<[1], [0], [0], [1], [0, 0, 1, 1], [], []>} : vector<1x32xf32>, vector<32x128xf32>, vector<1x128xf32> -> vector<1x128xf32>
    %156 = arith.addf %154, %155 : vector<1x128xf32>
    %157 = vector.extract_strided_slice %156 {offsets = [0, 0], sizes = [1, 32], strides = [1, 1]} : vector<1x128xf32> to vector<1x32xf32>
    %158 = arith.negf %157 : vector<1x32xf32>
    %159 = math.exp %158 : vector<1x32xf32>
    %cst_36 = arith.constant 1.000000e+00 : f32
    %160 = vector.broadcast %cst_36 : f32 to vector<1x32xf32>
    %161 = arith.addf %160, %159 : vector<1x32xf32>
    %162 = arith.divf %160, %161 : vector<1x32xf32>
    %163 = vector.extract_strided_slice %156 {offsets = [0, 32], sizes = [1, 32], strides = [1, 1]} : vector<1x128xf32> to vector<1x32xf32>
    %164 = arith.negf %163 : vector<1x32xf32>
    %165 = math.exp %164 : vector<1x32xf32>
    %cst_37 = arith.constant 1.000000e+00 : f32
    %166 = vector.broadcast %cst_37 : f32 to vector<1x32xf32>
    %167 = arith.addf %166, %165 : vector<1x32xf32>
    %168 = arith.divf %166, %167 : vector<1x32xf32>
    %169 = vector.extract_strided_slice %156 {offsets = [0, 64], sizes = [1, 32], strides = [1, 1]} : vector<1x128xf32> to vector<1x32xf32>
    %170 = math.tanh %169 : vector<1x32xf32>
    %171 = vector.extract_strided_slice %156 {offsets = [0, 96], sizes = [1, 32], strides = [1, 1]} : vector<1x128xf32> to vector<1x32xf32>
    %172 = arith.negf %171 : vector<1x32xf32>
    %173 = math.exp %172 : vector<1x32xf32>
    %cst_38 = arith.constant 1.000000e+00 : f32
    %174 = vector.broadcast %cst_38 : f32 to vector<1x32xf32>
    %175 = arith.addf %174, %173 : vector<1x32xf32>
    %176 = arith.divf %174, %175 : vector<1x32xf32>
    %177 = arith.mulf %168, %150 : vector<1x32xf32>
    %178 = arith.mulf %162, %170 : vector<1x32xf32>
    %179 = arith.addf %177, %178 : vector<1x32xf32>
    %180 = math.tanh %179 : vector<1x32xf32>
    %181 = arith.mulf %176, %180 : vector<1x32xf32>
    %c5 = arith.constant 5 : index
    %c0_39 = arith.constant 0 : index
    %182 = vector.load %arg7[%c5, %c0_39] : memref<8x32xf32, #tpu.memory_space<vmem>>, vector<1x32xf32>
    tpu.vector_store %arg7[%c5, %c0_39], %181 {strides = array<i32>} : memref<8x32xf32, #tpu.memory_space<vmem>>, vector<1x32xf32>,
    %183 = vector.extract_strided_slice %5 {offsets = [6, 0], sizes = [1, 128], strides = [1, 1]} : vector<8x128xf32> to vector<1x128xf32>
    %cst_40 = arith.constant dense<0.000000e+00> : vector<1x128xf32>
    %184 = tpu.matmul %181, %6, %cst_40 {dimension_numbers = #tpu.dot_dimension_numbers<[1], [0], [0], [1], [0, 0, 1, 1], [], []>} : vector<1x32xf32>, vector<32x128xf32>, vector<1x128xf32> -> vector<1x128xf32>
    %185 = arith.addf %183, %184 : vector<1x128xf32>
    %186 = vector.extract_strided_slice %185 {offsets = [0, 0], sizes = [1, 32], strides = [1, 1]} : vector<1x128xf32> to vector<1x32xf32>
    %187 = arith.negf %186 : vector<1x32xf32>
    %188 = math.exp %187 : vector<1x32xf32>
    %cst_41 = arith.constant 1.000000e+00 : f32
    %189 = vector.broadcast %cst_41 : f32 to vector<1x32xf32>
    %190 = arith.addf %189, %188 : vector<1x32xf32>
    %191 = arith.divf %189, %190 : vector<1x32xf32>
    %192 = vector.extract_strided_slice %185 {offsets = [0, 32], sizes = [1, 32], strides = [1, 1]} : vector<1x128xf32> to vector<1x32xf32>
    %193 = arith.negf %192 : vector<1x32xf32>
    %194 = math.exp %193 : vector<1x32xf32>
    %cst_42 = arith.constant 1.000000e+00 : f32
    %195 = vector.broadcast %cst_42 : f32 to vector<1x32xf32>
    %196 = arith.addf %195, %194 : vector<1x32xf32>
    %197 = arith.divf %195, %196 : vector<1x32xf32>
    %198 = vector.extract_strided_slice %185 {offsets = [0, 64], sizes = [1, 32], strides = [1, 1]} : vector<1x128xf32> to vector<1x32xf32>
    %199 = math.tanh %198 : vector<1x32xf32>
    %200 = vector.extract_strided_slice %185 {offsets = [0, 96], sizes = [1, 32], strides = [1, 1]} : vector<1x128xf32> to vector<1x32xf32>
    %201 = arith.negf %200 : vector<1x32xf32>
    %202 = math.exp %201 : vector<1x32xf32>
    %cst_43 = arith.constant 1.000000e+00 : f32
    %203 = vector.broadcast %cst_43 : f32 to vector<1x32xf32>
    %204 = arith.addf %203, %202 : vector<1x32xf32>
    %205 = arith.divf %203, %204 : vector<1x32xf32>
    %206 = arith.mulf %197, %179 : vector<1x32xf32>
    %207 = arith.mulf %191, %199 : vector<1x32xf32>
    %208 = arith.addf %206, %207 : vector<1x32xf32>
    %209 = math.tanh %208 : vector<1x32xf32>
    %210 = arith.mulf %205, %209 : vector<1x32xf32>
    %c6 = arith.constant 6 : index
    %c0_44 = arith.constant 0 : index
    %211 = vector.load %arg7[%c6, %c0_44] : memref<8x32xf32, #tpu.memory_space<vmem>>, vector<1x32xf32>
    tpu.vector_store %arg7[%c6, %c0_44], %210 {strides = array<i32>} : memref<8x32xf32, #tpu.memory_space<vmem>>, vector<1x32xf32>,
    %212 = vector.extract_strided_slice %5 {offsets = [7, 0], sizes = [1, 128], strides = [1, 1]} : vector<8x128xf32> to vector<1x128xf32>
    %cst_45 = arith.constant dense<0.000000e+00> : vector<1x128xf32>
    %213 = tpu.matmul %210, %6, %cst_45 {dimension_numbers = #tpu.dot_dimension_numbers<[1], [0], [0], [1], [0, 0, 1, 1], [], []>} : vector<1x32xf32>, vector<32x128xf32>, vector<1x128xf32> -> vector<1x128xf32>
    %214 = arith.addf %212, %213 : vector<1x128xf32>
    %215 = vector.extract_strided_slice %214 {offsets = [0, 0], sizes = [1, 32], strides = [1, 1]} : vector<1x128xf32> to vector<1x32xf32>
    %216 = arith.negf %215 : vector<1x32xf32>
    %217 = math.exp %216 : vector<1x32xf32>
    %cst_46 = arith.constant 1.000000e+00 : f32
    %218 = vector.broadcast %cst_46 : f32 to vector<1x32xf32>
    %219 = arith.addf %218, %217 : vector<1x32xf32>
    %220 = arith.divf %218, %219 : vector<1x32xf32>
    %221 = vector.extract_strided_slice %214 {offsets = [0, 32], sizes = [1, 32], strides = [1, 1]} : vector<1x128xf32> to vector<1x32xf32>
    %222 = arith.negf %221 : vector<1x32xf32>
    %223 = math.exp %222 : vector<1x32xf32>
    %cst_47 = arith.constant 1.000000e+00 : f32
    %224 = vector.broadcast %cst_47 : f32 to vector<1x32xf32>
    %225 = arith.addf %224, %223 : vector<1x32xf32>
    %226 = arith.divf %224, %225 : vector<1x32xf32>
    %227 = vector.extract_strided_slice %214 {offsets = [0, 64], sizes = [1, 32], strides = [1, 1]} : vector<1x128xf32> to vector<1x32xf32>
    %228 = math.tanh %227 : vector<1x32xf32>
    %229 = vector.extract_strided_slice %214 {offsets = [0, 96], sizes = [1, 32], strides = [1, 1]} : vector<1x128xf32> to vector<1x32xf32>
    %230 = arith.negf %229 : vector<1x32xf32>
    %231 = math.exp %230 : vector<1x32xf32>
    %cst_48 = arith.constant 1.000000e+00 : f32
    %232 = vector.broadcast %cst_48 : f32 to vector<1x32xf32>
    %233 = arith.addf %232, %231 : vector<1x32xf32>
    %234 = arith.divf %232, %233 : vector<1x32xf32>
    %235 = arith.mulf %226, %208 : vector<1x32xf32>
    %236 = arith.mulf %220, %228 : vector<1x32xf32>
    %237 = arith.addf %235, %236 : vector<1x32xf32>
    %238 = math.tanh %237 : vector<1x32xf32>
    %239 = arith.mulf %234, %238 : vector<1x32xf32>
    %c7 = arith.constant 7 : index
    %c0_49 = arith.constant 0 : index
    %240 = vector.load %arg7[%c7, %c0_49] : memref<8x32xf32, #tpu.memory_space<vmem>>, vector<1x32xf32>
    tpu.vector_store %arg7[%c7, %c0_49], %239 {strides = array<i32>} : memref<8x32xf32, #tpu.memory_space<vmem>>, vector<1x32xf32>,
    %c0_50 = arith.constant 0 : index
    %c0_51 = arith.constant 0 : index
    %241 = vector.load %arg7[%c0_50, %c0_51] : memref<8x32xf32, #tpu.memory_space<vmem>>, vector<8x32xf32>
    %242 = arith.truncf %241 : vector<8x32xf32> to vector<8x32xbf16>
    %c0_52 = arith.constant 0 : index
    %c0_53 = arith.constant 0 : index
    %243 = vector.load %arg4[%c0_52, %c0_53] : memref<32x8xbf16, #tpu.memory_space<vmem>>, vector<32x8xbf16>
    %cst_54 = arith.constant dense<0.000000e+00> : vector<8x8xf32>
    %244 = tpu.matmul %242, %243, %cst_54 {dimension_numbers = #tpu.dot_dimension_numbers<[1], [0], [0], [1], [0, 0, 1, 1], [], []>} : vector<8x32xbf16>, vector<32x8xbf16>, vector<8x8xf32> -> vector<8x8xf32>
    %c0_55 = arith.constant 0 : index
    %c0_56 = arith.constant 0 : index
    %245 = vector.load %arg5[%c0_55, %c0_56] : memref<1x8xf32, #tpu.memory_space<vmem>>, vector<1x8xf32>
    %246 = vector.broadcast %245 : vector<1x8xf32> to vector<8x8xf32>
    %247 = arith.addf %244, %246 : vector<8x8xf32>
    %cst_57 = arith.constant dense<0xFF800000> : vector<8xf32>
    %248 = vector.multi_reduction <maximumf>, %247, %cst_57 [1] : vector<8x8xf32> to vector<8xf32>
    %249 = vector.shape_cast %248 : vector<8xf32> to vector<8x1xf32>
    %250 = vector.broadcast %249 : vector<8x1xf32> to vector<8x8xf32>
    %251 = arith.subf %247, %250 : vector<8x8xf32>
    %252 = math.exp %251 : vector<8x8xf32>
    %cst_58 = arith.constant dense<0.000000e+00> : vector<8xf32>
    %253 = vector.multi_reduction <add>, %252, %cst_58 [1] : vector<8x8xf32> to vector<8xf32>
    %254 = vector.shape_cast %253 : vector<8xf32> to vector<8x1xf32>
    %255 = math.log %254 : vector<8x1xf32>
    %256 = vector.broadcast %255 : vector<8x1xf32> to vector<8x8xf32>
    %257 = arith.subf %251, %256 : vector<8x8xf32>
    %c0_59 = arith.constant 0 : index
    %c0_60 = arith.constant 0 : index
    %258 = vector.load %arg6[%c0_59, %c0_60] : memref<8x8xf32, #tpu.memory_space<vmem>>, vector<8x8xf32>
    tpu.vector_store %arg6[%c0_59, %c0_60], %257 {strides = array<i32>} : memref<8x8xf32, #tpu.memory_space<vmem>>, vector<8x8xf32>,
    return
  }
}

</mosaic_0001>

<bundles_post_ra>
// kernel: tpu_custom_call.1
= control target key start
LH: loop header
LB: loop body
LE: loop exit
PB: predicated region body
PF: predicated region fallthrough
CT: control target
= control target key end

     0   :  { %11 = vsyncpa [#allocation4], 0  ;;  %s1633_s0 = inlined_call_operand.vmem [shape: bf16[8,32], index: 0, kind: input, shape index: {}]   ;;  %s1634_s1 = inlined_call_operand.vmem [shape: bf16[32,128], index: 1, kind: input, shape index: {}]   ;;  %s1635_s2 = inlined_call_operand.hbm [shape: f32[32,128], index: 2, kind: input, shape index: {}]   ;;  %s1636_s3 = inlined_call_operand.vmem [shape: f32[1,128], index: 3, kind: input, shape index: {}]   ;;  %s1637_s4 = inlined_call_operand.vmem [shape: bf16[32,8], index: 4, kind: input, shape index: {}]   ;;  %s1638_s5 = inlined_call_operand.vmem [shape: f32[1,8], index: 5, kind: input, shape index: {}]   ;;  %s1639_s6 = inlined_call_operand.hbm [shape: f32[8,8], index: 6, kind: output, shape index: {}]  }
   0x1   :  { %12 = vsyncpa [#allocation5], 0  ;;  %s1390_s21 = smov [#allocation3]  }
   0x2   :  { %s22_s22 = sshll.u32 %s1390_s21, 4  ;;  %s23_s22 = int_to_ptr.vmem [resolvable:$true] %s22_s22 }
   0x3   :  { %s1354_s23 = scalar_lea.vmem %s23_s22, 512  ;;  %p1359_p1 = scmp.lt.s32.totalorder %s23_s22, %s23_s22 }
   0x4   :  { %p1355_p0 = scmp.ne.s32.totalorder %s23_s22, %s1354_s23  ;;  %p1360_p2 = scmp.lt.s32.totalorder %s1354_s23, %s1354_s23 }
   0x6   :  { %p1361_p3 = por %p1360_p2, %p1359_p1 }
   0x8   :  { %p1362_p4 = pnand %p1361_p3, %p1355_p0 }
   0xa   :  { %1365 = shalt.err (!%p1362_p4)
}
   0xb   :  { %s1391_s24 = smov 128   ;;  %s1392_s25 = smov 8  }
   0xc   :  { %28 = dma.hbm_to_vmem [thread:$0]  %s1635_s2, 512, %s23_s22, [#allocation4], %s1391_s24, %s1391_s24, %s1392_s25  }
   0xd   :  { %1386 = dma.done.wait [#allocation4], 512  }
   0xe   :  { %1387 = vsyncadd [#allocation4], 4294966784  ;;  %v1393_v0 = vmov 0.0   ;;  %vm1394_vm0 = vmmov 0   ;;  %v1274_v1 = vld [vmem:[%s1634_s1 + $0x8] sm:$0xff]   ;;  %v1445_v2 = vld [vmem:[#allocation3 + $0x18] sm:$0xff] }
   0xf   :  { %1162 = vmatprep.subr.bf16.mxu0 %v1393_v0  ;;  %1170 = vmatprep.subr.mxu1 %v1393_v0  ;;  %v1447_v3 = vld [vmem:[#allocation3 + $0x10] sm:$0xff]  ;;  %v1275_v4 = vld [vmem:[%s1634_s1] sm:$0xff]   ;;  %v1455_v5 = vld [vmem:[#allocation3 + $0x8] sm:$0xff]  ;;  %vm63_vm1 = vcmask 261120   ;;  %s1395_s9 = smov 64   ;;  %vm213_vm2 = vcmask 253952  }
  0x10   :  { %1166 = vmatprep.mubr.msk.bf16.mxu0 %vm1394_vm0, %v1393_v0  ;;  %1178 = vmatprep.mubr.msk.f32.mxu1 %vm1394_vm0, %v1393_v0  ;;  %v1459_v6 = vld [vmem:[#allocation3] sm:$0xff]  ;;  %v39_v7 = vld [vmem:[%s1633_s0] sm:$0xf]  ;;  %vm322_vm3 = vcmask 254977   ;;  %vm546_vm4 = vcmask 257027   ;;  %vm770_vm5 = vcmask 259077  }
  0x11   :  { %1163 = vmatpush3.bf16.msra.mxu0 %v1274_v1  ;;  %1171 = vmatpush3.msra.mxu1 %v1445_v2  ;;  %v1093_v8 = vld [vmem:[%s1636_s3] ss:$0 sm:$0xff]  ;;  %s1396_s3 = smov 32   ;;  %vm434_vm6 = vcmask 256002   ;;  %vm658_vm7 = vcmask 258052   ;;  %vm882_vm8 = vcmask 260102  }
  0x12   :  { %1172 = vmatprep.subr.mxu1 %v1393_v0  ;;  %1164 = vmatprep.subr.bf16.mxu0 %v1393_v0  ;;  %vm994_vm9 = vcmask 261127   ;;  %vm1064_vm10 = vcmask 64512  }
  0x13   :  { %1173 = vmatpush3.msra.mxu1 %v1447_v3 }
  0x14   :  { %1174 = vmatprep.subr.mxu1 %v1393_v0 }
  0x15   :  { %1165 = vmatpush3.bf16.msra.mxu0 %v1275_v4  ;;  %1175 = vmatpush3.msra.mxu1 %v1455_v5 }
  0x16   :  { %1176 = vmatprep.subr.mxu1 %v1393_v0  ;;  %1181 = vmatprep.subr.mxu0 %v1393_v0 }
  0x17   :  { %1177 = vmatpush3.msra.mxu1 %v1459_v6 }
  0x18   :  { %1167 = vmatmul.mubr.msk.bf16.vlgmr.msra.gmra.mxu0 %vm63_vm1, %v39_v7  ;;  %1179 = vmatmul.mubr.f32.vlgmr.msra.gmra.mxu1 %v1393_v0 }
  0x19   :  { %1182 = vmatpush3.msra.mxu0 %v1445_v2  ;;  %1189 = vmatprep.mubr.msk.f32.mxu0 %vm1394_vm0, %v1393_v0 }
  0x1a   :  { %1183 = vmatprep.subr.mxu0 %v1393_v0  ;;  %1192 = vmatprep.subr.mxu1 %v1393_v0 }
  0x1b   :  { %1184 = vmatpush3.msra.mxu0 %v1447_v3  ;;  %1193 = vmatpush3.msra.mxu1 %v1445_v2 }
  0x1c   :  { %1185 = vmatprep.subr.mxu0 %v1393_v0  ;;  %1194 = vmatprep.subr.mxu1 %v1393_v0 }
  0x1d   :  { %1186 = vmatpush3.msra.mxu0 %v1455_v5  ;;  %1195 = vmatpush3.msra.mxu1 %v1447_v3 }
  0x1e   :  { %1187 = vmatprep.subr.mxu0 %v1393_v0  ;;  %1196 = vmatprep.subr.mxu1 %v1393_v0 }
  0x1f   :  { %1188 = vmatpush3.msra.mxu0 %v1459_v6  ;;  %1197 = vmatpush3.msra.mxu1 %v1455_v5 }
  0x20   :  { %1198 = vmatprep.subr.mxu1 %v1393_v0  ;;  %1200 = vmatprep.mubr.msk.f32.mxu1 %vm1394_vm0, %v1393_v0 }
  0x21   :  { %1199 = vmatpush3.msra.mxu1 %v1459_v6  ;;  %1203 = vmatprep.subr.mxu0 %v1393_v0 }
  0x22   :  { %1214 = vmatprep.subr.mxu1 %v1393_v0 }
  0xd8   :  { %v101_v9 = vpop.f32.mrf.mxu0  ;;  %v180_v10 = vpop.f32.mrf.mxu1 }
  0xd9   :  { %v1494_v11 = vadd.f32 %v1093_v8, %v101_v9 }
  0xda   :  { %v1168_v12 = vpop.f32.mrf.mxu0  ;;  %v1180_v13 = vpop.f32.mrf.mxu1 }
  0xdb   :  { %v184_v14 = vadd.f32 %v180_v10, %v1494_v11 }
  0xdc   :  { %v104_v15 = vpop.f32.mrf.mxu0 }
  0xdd   :  { %1278 = vtanh.f32 %v184_v14  ;;  %v1097_v18 = vmul.f32 -1.442695, %v184_v14 }
  0xde   :  { %v1169_v16 = vpop.f32.mrf.mxu0 }
  0xdf   :  { %1280 = vpow2.f32 %v1097_v18 }
  0xea   :  { %v1279_v17 = vpop.eup %1278 }
  0xeb   :  { %194 = vrot.lane.b32.xlu0 %v1279_v17, %s1395_s9 }
  0xec   :  { %v1281_v19 = vpop.eup %1280 }
  0xed   :  { %v188_v20 = vadd.f32 1.0, %v1281_v19 }
  0xef   :  { %1282 = vrcp.f32 %v188_v20 }
  0xfc   :  { %v1283_v21 = vpop.eup %1282 }
  0xfd   :  { %v192_v24 = vmul.f32 0.0, %v1283_v21 }
 0x15d   :  { %v195_v22 = vpop.permute.xlu0 %194 }
 0x15e   :  { %v197_v23 = vmul.f32 %v1283_v21, %v195_v22 }
 0x160   :  { %199 = vrot.lane.b32.xlu0 %v197_v23, %s1396_s3 }
 0x1d2   :  { %v200_v25 = vpop.permute.xlu0 %199 }
 0x1d3   :  { %v202_v26 = vadd.f32 %v200_v25, %v192_v24 }
 0x1d5   :  { %1284 = vtanh.f32 %v202_v26  ;;  %v299_v42 = vrot.slane %v202_v26, 7 }
 0x1e2   :  { %v1285_v27 = vpop.eup %1284 }
 0x1e3   :  { %205 = vrot.lane.b32.xlu1 %v1285_v27, %s1395_s9 }
 0x255   :  { %v206_v28 = vpop.permute.xlu1 %205 }
 0x256   :  { %v208_v29 = vmul.f32 %v1283_v21, %v206_v28 }
 0x258   :  { %210 = vrot.lane.b32.xlu1 %v208_v29, %s1396_s3 }
 0x2ca   :  { %v211_v30 = vpop.permute.xlu1 %210 }
 0x2cb   :  { %214 = vst.msk [vmem:[#allocation2] sm:$0x1] %vm213_vm2, %v211_v30  ;;  %1190 = vmatmul.mubr.msk.f32.vlgmr.msra.gmra.mxu0 %vm63_vm1, %v211_v30 }
 0x2cc   :  { %1204 = vmatpush3.msra.mxu0 %v1445_v2  ;;  %1211 = vmatprep.mubr.msk.f32.mxu0 %vm1394_vm0, %v1393_v0 }
 0x2cd   :  { %1205 = vmatprep.subr.mxu0 %v1393_v0 }
 0x2ce   :  { %1206 = vmatpush3.msra.mxu0 %v1447_v3 }
 0x2cf   :  { %1207 = vmatprep.subr.mxu0 %v1393_v0 }
 0x2d0   :  { %1208 = vmatpush3.msra.mxu0 %v1455_v5 }
 0x2d1   :  { %1209 = vmatprep.subr.mxu0 %v1393_v0 }
 0x2d2   :  { %1210 = vmatpush3.msra.mxu0 %v1459_v6 }
 0x2d3   :  { %1225 = vmatprep.subr.mxu0 %v1393_v0 }
 0x38b   :  { %v283_v31 = vpop.f32.mrf.mxu0 }
 0x38c   :  { %v288_v32 = vrot.slane %v283_v31, 7 }
 0x38d   :  { %v1191_v33 = vpop.f32.mrf.mxu0 }
 0x38e   :  { %v290_v34 = vadd.f32 %v288_v32, %v1494_v11 }
 0x390   :  { %1286 = vtanh.f32 %v290_v34  ;;  %v1099_v36 = vmul.f32 -1.442695, %v290_v34 }
 0x392   :  { %1288 = vpow2.f32 %v1099_v36 }
 0x39d   :  { %v1287_v35 = vpop.eup %1286 }
 0x39e   :  { %303 = vrot.lane.b32.xlu0 %v1287_v35, %s1395_s9 }
 0x39f   :  { %v1289_v37 = vpop.eup %1288 }
 0x3a0   :  { %v294_v38 = vadd.f32 1.0, %v1289_v37 }
 0x3a2   :  { %1290 = vrcp.f32 %v294_v38 }
 0x3af   :  { %v1291_v39 = vpop.eup %1290 }
 0x3b0   :  { %v301_v43 = vmul.f32 %v1291_v39, %v299_v42 }
 0x410   :  { %v304_v40 = vpop.permute.xlu0 %303 }
 0x411   :  { %v306_v41 = vmul.f32 %v1291_v39, %v304_v40 }
 0x413   :  { %308 = vrot.lane.b32.xlu1 %v306_v41, %s1396_s3 }
 0x485   :  { %v309_v44 = vpop.permute.xlu1 %308 }
 0x486   :  { %v311_v45 = vadd.f32 %v309_v44, %v301_v43 }
 0x488   :  { %1292 = vtanh.f32 %v311_v45  ;;  %v411_v62 = vrot.slane %v311_v45, 7 }
 0x495   :  { %v1293_v46 = vpop.eup %1292 }
 0x496   :  { %314 = vrot.lane.b32.xlu0 %v1293_v46, %s1395_s9 }
 0x508   :  { %v315_v47 = vpop.permute.xlu0 %314 }
 0x509   :  { %v1516_v48 = vmul.f32 %v1291_v39, %v315_v47 }
 0x50b   :  { %v324_v49 = vrot.slane %v1516_v48, 1 }
 0x50d   :  { %325 = vrot.lane.b32.xlu1 %v324_v49, %s1396_s3 }
 0x57f   :  { %v326_v50 = vpop.permute.xlu1 %325 }
 0x580   :  { %1201 = vmatmul.mubr.msk.f32.vlgmr.msra.gmra.mxu1 %vm63_vm1, %v326_v50 }
 0x581   :  { %1215 = vmatpush3.msra.mxu1 %v1445_v2  ;;  %1222 = vmatprep.mubr.msk.f32.mxu1 %vm1394_vm0, %v1393_v0 }
 0x582   :  { %1216 = vmatprep.subr.mxu1 %v1393_v0 }
 0x583   :  { %1217 = vmatpush3.msra.mxu1 %v1447_v3 }
 0x584   :  { %1218 = vmatprep.subr.mxu1 %v1393_v0 }
 0x585   :  { %1219 = vmatpush3.msra.mxu1 %v1455_v5 }
 0x586   :  { %1220 = vmatprep.subr.mxu1 %v1393_v0 }
 0x587   :  { %1221 = vmatpush3.msra.mxu1 %v1459_v6 }
 0x588   :  { %1236 = vmatprep.subr.mxu1 %v1393_v0 }
 0x640   :  { %v395_v51 = vpop.f32.mrf.mxu1 }
 0x641   :  { %v400_v52 = vrot.slane %v395_v51, 6 }
 0x642   :  { %v1202_v53 = vpop.f32.mrf.mxu1 }
 0x643   :  { %v402_v54 = vadd.f32 %v400_v52, %v1494_v11 }
 0x645   :  { %1294 = vtanh.f32 %v402_v54  ;;  %v1101_v56 = vmul.f32 -1.442695, %v402_v54 }
 0x647   :  { %1296 = vpow2.f32 %v1101_v56 }
 0x652   :  { %v1295_v55 = vpop.eup %1294 }
 0x653   :  { %415 = vrot.lane.b32.xlu0 %v1295_v55, %s1395_s9 }
 0x654   :  { %v1297_v57 = vpop.eup %1296 }
 0x655   :  { %v406_v58 = vadd.f32 1.0, %v1297_v57 }
 0x657   :  { %1298 = vrcp.f32 %v406_v58 }
 0x664   :  { %v1299_v59 = vpop.eup %1298 }
 0x665   :  { %v413_v63 = vmul.f32 %v1299_v59, %v411_v62 }
 0x6c5   :  { %v416_v60 = vpop.permute.xlu0 %415 }
 0x6c6   :  { %v418_v61 = vmul.f32 %v1299_v59, %v416_v60 }
 0x6c8   :  { %420 = vrot.lane.b32.xlu1 %v418_v61, %s1396_s3 }
 0x73a   :  { %v421_v1 = vpop.permute.xlu1 %420 }
 0x73b   :  { %v423_v4 = vadd.f32 %v421_v1, %v413_v63 }
 0x73d   :  { %1300 = vtanh.f32 %v423_v4  ;;  %v523_v24 = vrot.slane %v423_v4, 7 }
 0x74a   :  { %v1301_v7 = vpop.eup %1300 }
 0x74b   :  { %426 = vrot.lane.b32.xlu0 %v1301_v7, %s1395_s9 }
 0x7bd   :  { %v427_v8 = vpop.permute.xlu0 %426 }
 0x7be   :  { %v1535_v9 = vmul.f32 %v1299_v59, %v427_v8 }
 0x7c0   :  { %v436_v10 = vrot.slane %v1535_v9, 2 }
 0x7c2   :  { %437 = vrot.lane.b32.xlu1 %v436_v10, %s1396_s3 }
 0x834   :  { %v438_v12 = vpop.permute.xlu1 %437 }
 0x835   :  { %1212 = vmatmul.mubr.msk.f32.vlgmr.msra.gmra.mxu0 %vm63_vm1, %v438_v12 }
 0x836   :  { %1226 = vmatpush3.msra.mxu0 %v1445_v2  ;;  %1233 = vmatprep.mubr.msk.f32.mxu0 %vm1394_vm0, %v1393_v0 }
 0x837   :  { %1227 = vmatprep.subr.mxu0 %v1393_v0 }
 0x838   :  { %1228 = vmatpush3.msra.mxu0 %v1447_v3 }
 0x839   :  { %1229 = vmatprep.subr.mxu0 %v1393_v0 }
 0x83a   :  { %1230 = vmatpush3.msra.mxu0 %v1455_v5 }
 0x83b   :  { %1231 = vmatprep.subr.mxu0 %v1393_v0 }
 0x83c   :  { %1232 = vmatpush3.msra.mxu0 %v1459_v6 }
 0x83d   :  { %1247 = vmatprep.subr.mxu0 %v1393_v0 }
 0x8f5   :  { %v507_v13 = vpop.f32.mrf.mxu0 }
 0x8f6   :  { %v512_v14 = vrot.slane %v507_v13, 5 }
 0x8f7   :  { %v1213_v15 = vpop.f32.mrf.mxu0 }
 0x8f8   :  { %v514_v16 = vadd.f32 %v512_v14, %v1494_v11 }
 0x8fa   :  { %1302 = vtanh.f32 %v514_v16  ;;  %v1103_v18 = vmul.f32 -1.442695, %v514_v16 }
 0x8fc   :  { %1304 = vpow2.f32 %v1103_v18 }
 0x907   :  { %v1303_v17 = vpop.eup %1302 }
 0x908   :  { %527 = vrot.lane.b32.xlu0 %v1303_v17, %s1395_s9 }
 0x909   :  { %v1305_v19 = vpop.eup %1304 }
 0x90a   :  { %v518_v20 = vadd.f32 1.0, %v1305_v19 }
 0x90c   :  { %1306 = vrcp.f32 %v518_v20 }
 0x919   :  { %v1307_v21 = vpop.eup %1306 }
 0x91a   :  { %v525_v25 = vmul.f32 %v1307_v21, %v523_v24 }
 0x97a   :  { %v528_v22 = vpop.permute.xlu0 %527 }
 0x97b   :  { %v530_v23 = vmul.f32 %v1307_v21, %v528_v22 }
 0x97d   :  { %532 = vrot.lane.b32.xlu1 %v530_v23, %s1396_s3 }
 0x9ef   :  { %v533_v26 = vpop.permute.xlu1 %532 }
 0x9f0   :  { %v535_v27 = vadd.f32 %v533_v26, %v525_v25 }
 0x9f2   :  { %1308 = vtanh.f32 %v535_v27  ;;  %v635_v44 = vrot.slane %v535_v27, 7 }
 0x9ff   :  { %v1309_v28 = vpop.eup %1308 }
 0xa00   :  { %538 = vrot.lane.b32.xlu0 %v1309_v28, %s1395_s9 }
 0xa72   :  { %v539_v29 = vpop.permute.xlu0 %538 }
 0xa73   :  { %v1554_v30 = vmul.f32 %v1307_v21, %v539_v29 }
 0xa75   :  { %v548_v31 = vrot.slane %v1554_v30, 3 }
 0xa77   :  { %549 = vrot.lane.b32.xlu1 %v548_v31, %s1396_s3 }
 0xae9   :  { %v550_v32 = vpop.permute.xlu1 %549 }
 0xaea   :  { %1223 = vmatmul.mubr.msk.f32.vlgmr.msra.gmra.mxu1 %vm63_vm1, %v550_v32 }
 0xaeb   :  { %1237 = vmatpush3.msra.mxu1 %v1445_v2  ;;  %1244 = vmatprep.mubr.msk.f32.mxu1 %vm1394_vm0, %v1393_v0 }
 0xaec   :  { %1238 = vmatprep.subr.mxu1 %v1393_v0 }
 0xaed   :  { %1239 = vmatpush3.msra.mxu1 %v1447_v3 }
 0xaee   :  { %1240 = vmatprep.subr.mxu1 %v1393_v0 }
 0xaef   :  { %1241 = vmatpush3.msra.mxu1 %v1455_v5 }
 0xaf0   :  { %1242 = vmatprep.subr.mxu1 %v1393_v0 }
 0xaf1   :  { %1243 = vmatpush3.msra.mxu1 %v1459_v6 }
 0xaf2   :  { %1258 = vmatprep.subr.bf16.mxu1 %v1393_v0 }
 0xbaa   :  { %v619_v33 = vpop.f32.mrf.mxu1 }
 0xbab   :  { %v624_v34 = vrot.slane %v619_v33, 4 }
 0xbac   :  { %v1224_v35 = vpop.f32.mrf.mxu1 }
 0xbad   :  { %v626_v36 = vadd.f32 %v624_v34, %v1494_v11 }
 0xbaf   :  { %1310 = vtanh.f32 %v626_v36  ;;  %v1105_v38 = vmul.f32 -1.442695, %v626_v36 }
 0xbb1   :  { %1312 = vpow2.f32 %v1105_v38 }
 0xbbc   :  { %v1311_v37 = vpop.eup %1310 }
 0xbbd   :  { %639 = vrot.lane.b32.xlu0 %v1311_v37, %s1395_s9 }
 0xbbe   :  { %v1313_v39 = vpop.eup %1312 }
 0xbbf   :  { %v630_v40 = vadd.f32 1.0, %v1313_v39 }
 0xbc1   :  { %1314 = vrcp.f32 %v630_v40 }
 0xbce   :  { %v1315_v41 = vpop.eup %1314 }
 0xbcf   :  { %v637_v45 = vmul.f32 %v1315_v41, %v635_v44 }
 0xc2f   :  { %v640_v42 = vpop.permute.xlu0 %639 }
 0xc30   :  { %v642_v43 = vmul.f32 %v1315_v41, %v640_v42 }
 0xc32   :  { %644 = vrot.lane.b32.xlu1 %v642_v43, %s1396_s3 }
 0xca4   :  { %v645_v46 = vpop.permute.xlu1 %644 }
 0xca5   :  { %v647_v47 = vadd.f32 %v645_v46, %v637_v45 }
 0xca7   :  { %1316 = vtanh.f32 %v647_v47 }
 0xcb4   :  { %v1317_v49 = vpop.eup %1316 }
 0xcb5   :  { %650 = vrot.lane.b32.xlu0 %v1317_v49, %s1395_s9 }
 0xd27   :  { %v651_v50 = vpop.permute.xlu0 %650 }
 0xd28   :  { %v1573_v51 = vmul.f32 %v1315_v41, %v651_v50 }
 0xd2a   :  { %v660_v52 = vrot.slane %v1573_v51, 4 }
 0xd2c   :  { %661 = vrot.lane.b32.xlu1 %v660_v52, %s1396_s3 }
 0xd9e   :  { %v662_v53 = vpop.permute.xlu1 %661 }
 0xd9f   :  { %1234 = vmatmul.mubr.msk.f32.vlgmr.msra.gmra.mxu0 %vm63_vm1, %v662_v53  ;;  %v1277_v53 = vld [vmem:[%s1637_s4] sm:$0xff]  }
 0xda0   :  { %1248 = vmatpush3.msra.mxu0 %v1445_v2  ;;  %1255 = vmatprep.mubr.msk.f32.mxu0 %vm1394_vm0, %v1393_v0 }
 0xda1   :  { %1249 = vmatprep.subr.mxu0 %v1393_v0 }
 0xda2   :  { %1250 = vmatpush3.msra.mxu0 %v1447_v3 }
 0xda3   :  { %1251 = vmatprep.subr.mxu0 %v1393_v0 }
 0xda4   :  { %1252 = vmatpush3.msra.mxu0 %v1455_v5 }
 0xda5   :  { %1253 = vmatprep.subr.mxu0 %v1393_v0 }
 0xda6   :  { %1254 = vmatpush3.msra.mxu0 %v1459_v6  ;;  %v747_v6 = vrot.slane %v647_v47, 7 }
 0xe5f   :  { %v731_v54 = vpop.f32.mrf.mxu0 }
 0xe60   :  { %v736_v55 = vrot.slane %v731_v54, 3 }
 0xe61   :  { %v1235_v56 = vpop.f32.mrf.mxu0 }
 0xe62   :  { %v738_v2 = vadd.f32 %v736_v55, %v1494_v11 }
 0xe64   :  { %1318 = vtanh.f32 %v738_v2  ;;  %v1107_v58 = vmul.f32 -1.442695, %v738_v2 }
 0xe66   :  { %1320 = vpow2.f32 %v1107_v58 }
 0xe71   :  { %v1319_v57 = vpop.eup %1318 }
 0xe72   :  { %751 = vrot.lane.b32.xlu0 %v1319_v57, %s1395_s9 }
 0xe73   :  { %v1321_v3 = vpop.eup %1320 }
 0xe74   :  { %v742_v59 = vadd.f32 1.0, %v1321_v3 }
 0xe76   :  { %1322 = vrcp.f32 %v742_v59 }
 0xe83   :  { %v1323_v60 = vpop.eup %1322 }
 0xe84   :  { %v749_v62 = vmul.f32 %v1323_v60, %v747_v6 }
 0xee4   :  { %v752_v5 = vpop.permute.xlu0 %751 }
 0xee5   :  { %v754_v61 = vmul.f32 %v1323_v60, %v752_v5 }
 0xee7   :  { %756 = vrot.lane.b32.xlu1 %v754_v61, %s1396_s3 }
 0xf59   :  { %v757_v63 = vpop.permute.xlu1 %756 }
 0xf5a   :  { %v759_v1 = vadd.f32 %v757_v63, %v749_v62 }
 0xf5c   :  { %1324 = vtanh.f32 %v759_v1  ;;  %v859_v24 = vrot.slane %v759_v1, 7 }
 0xf69   :  { %v1325_v4 = vpop.eup %1324 }
 0xf6a   :  { %762 = vrot.lane.b32.xlu0 %v1325_v4, %s1395_s9 }
 0xfdc   :  { %v763_v7 = vpop.permute.xlu0 %762 }
 0xfdd   :  { %v765_v8 = vmul.f32 %v1323_v60, %v763_v7 }
 0xfdf   :  { %v772_v10 = vrot.slane %v765_v8, 5 }
 0xfe1   :  { %773 = vrot.lane.b32.xlu1 %v772_v10, %s1396_s3 }
0x1053   :  { %v774_v12 = vpop.permute.xlu1 %773 }
0x1054   :  { %1245 = vmatmul.mubr.msk.f32.vlgmr.msra.gmra.mxu1 %vm63_vm1, %v774_v12 }
0x1055   :  { %1262 = vmatprep.mubr.msk.bf16.mxu1 %vm1394_vm0, %v1393_v0 }
0x1114   :  { %v843_v13 = vpop.f32.mrf.mxu1 }
0x1115   :  { %v848_v14 = vrot.slane %v843_v13, 2 }
0x1116   :  { %v1246_v15 = vpop.f32.mrf.mxu1 }
0x1117   :  { %v850_v16 = vadd.f32 %v848_v14, %v1494_v11 }
0x1119   :  { %1326 = vtanh.f32 %v850_v16  ;;  %v1109_v18 = vmul.f32 -1.442695, %v850_v16 }
0x111b   :  { %1328 = vpow2.f32 %v1109_v18 }
0x1126   :  { %v1327_v17 = vpop.eup %1326 }
0x1127   :  { %863 = vrot.lane.b32.xlu0 %v1327_v17, %s1395_s9 }
0x1128   :  { %v1329_v19 = vpop.eup %1328 }
0x1129   :  { %v854_v20 = vadd.f32 1.0, %v1329_v19 }
0x112b   :  { %1330 = vrcp.f32 %v854_v20 }
0x1138   :  { %v1331_v21 = vpop.eup %1330 }
0x1139   :  { %v861_v25 = vmul.f32 %v1331_v21, %v859_v24 }
0x1199   :  { %v864_v22 = vpop.permute.xlu0 %863 }
0x119a   :  { %v866_v23 = vmul.f32 %v1331_v21, %v864_v22 }
0x119c   :  { %868 = vrot.lane.b32.xlu1 %v866_v23, %s1396_s3 }
0x120e   :  { %v869_v26 = vpop.permute.xlu1 %868 }
0x120f   :  { %v871_v27 = vadd.f32 %v869_v26, %v861_v25 }
0x1211   :  { %1332 = vtanh.f32 %v871_v27 }
0x121e   :  { %v1333_v28 = vpop.eup %1332 }
0x121f   :  { %874 = vrot.lane.b32.xlu0 %v1333_v28, %s1395_s9 }
0x1291   :  { %v875_v29 = vpop.permute.xlu0 %874 }
0x1292   :  { %v877_v31 = vmul.f32 %v1331_v21, %v875_v29 }
0x1294   :  { %v884_v32 = vrot.slane %v877_v31, 6 }
0x1296   :  { %885 = vrot.lane.b32.xlu1 %v884_v32, %s1396_s3 }
0x1308   :  { %v886_v33 = vpop.permute.xlu1 %885 }
0x1309   :  { %1256 = vmatmul.mubr.msk.f32.vlgmr.msra.gmra.mxu0 %vm63_vm1, %v886_v33 }
0x13c9   :  { %v955_v34 = vpop.f32.mrf.mxu0 }
0x13ca   :  { %v960_v35 = vrot.slane %v955_v34, 1 }
0x13cb   :  { %v1257_v36 = vpop.f32.mrf.mxu0 }
0x13cc   :  { %v962_v37 = vadd.f32 %v960_v35, %v1494_v11  ;;  %v971_v11 = vrot.slane %v871_v27, 7 }
0x13ce   :  { %1334 = vtanh.f32 %v962_v37  ;;  %v1111_v39 = vmul.f32 -1.442695, %v962_v37 }
0x13d0   :  { %1336 = vpow2.f32 %v1111_v39 }
0x13db   :  { %v1335_v38 = vpop.eup %1334 }
0x13dc   :  { %975 = vrot.lane.b32.xlu0 %v1335_v38, %s1395_s9 }
0x13dd   :  { %v1337_v40 = vpop.eup %1336 }
0x13de   :  { %v966_v41 = vadd.f32 1.0, %v1337_v40 }
0x13e0   :  { %1338 = vrcp.f32 %v966_v41 }
0x13ed   :  { %v1339_v42 = vpop.eup %1338 }
0x13ee   :  { %v973_v45 = vmul.f32 %v1339_v42, %v971_v11 }
0x144e   :  { %v976_v43 = vpop.permute.xlu0 %975 }
0x144f   :  { %v978_v44 = vmul.f32 %v1339_v42, %v976_v43 }
0x1451   :  { %980 = vrot.lane.b32.xlu1 %v978_v44, %s1396_s3 }
0x1455   :  { %319 = vrot.lane.b32.xlu1 %v1516_v48, %s1396_s3 }
0x1459   :  { %543 = vrot.lane.b32.xlu1 %v1554_v30, %s1396_s3  ;;  %v1276_v30 = vld [vmem:[%s1637_s4 + $0x8] sm:$0xff]  }
0x145a   :  { %1259 = vmatpush3.bf16.msra.mxu1 %v1276_v30 }
0x145b   :  { %1260 = vmatprep.subr.bf16.mxu1 %v1393_v0  ;;  %v1112_v0 = vld [vmem:[%s1638_s5] ss:$0 sm:$0xff]  ;;  %s1397_s5 = smov [#allocation6]  }
0x145c   :  { %s1084_s15 = sshll.u32 %s1397_s5, 4  ;;  %s1085_s15 = int_to_ptr.vmem [resolvable:$true] %s1084_s15 }
0x145d   :  { %767 = vrot.lane.b32.xlu1 %v765_v8, %s1396_s3  ;;  %s1366_s16 = scalar_lea.vmem %s1085_s15, 128  ;;  %p1371_p6 = scmp.lt.s32.totalorder %s1085_s15, %s1085_s15 }
0x145e   :  { %1261 = vmatpush3.bf16.msra.mxu1 %v1277_v53  ;;  %p1367_p5 = scmp.ne.s32.totalorder %s1085_s15, %s1366_s16  ;;  %p1372_p7 = scmp.lt.s32.totalorder %s1366_s16, %s1366_s16 }
0x1460   :  { %p1373_p8 = por %p1372_p7, %p1371_p6 }
0x1462   :  { %p1374_p9 = pnand %p1373_p8, %p1367_p5 }
0x14c3   :  { %v981_v46 = vpop.permute.xlu1 %980 }
0x14c4   :  { %v983_v47 = vadd.f32 %v981_v46, %v973_v45 }
0x14c6   :  { %1340 = vtanh.f32 %v983_v47 }
0x14c7   :  { %v320_v49 = vpop.permute.xlu1 %319 }
0x14c8   :  { %323 = vst.msk [vmem:[#allocation2] sm:$0x2] %vm322_vm3, %v320_v49 }
0x14cb   :  { %v544_v50 = vpop.permute.xlu1 %543 }
0x14cc   :  { %547 = vst.msk [vmem:[#allocation2] sm:$0x8] %vm546_vm4, %v544_v50 }
0x14cf   :  { %v768_v52 = vpop.permute.xlu1 %767 }
0x14d0   :  { %771 = vst.msk [vmem:[#allocation2] sm:$0x20] %vm770_vm5, %v768_v52 }
0x14d3   :  { %v1341_v48 = vpop.eup %1340 }
0x14d4   :  { %986 = vrot.lane.b32.xlu0 %v1341_v48, %s1395_s9 }
0x14d8   :  { %431 = vrot.lane.b32.xlu0 %v1535_v9, %s1396_s3 }
0x14dc   :  { %655 = vrot.lane.b32.xlu0 %v1573_v51, %s1396_s3 }
0x14e0   :  { %879 = vrot.lane.b32.xlu0 %v877_v31, %s1396_s3 }
0x1546   :  { %v987_v54 = vpop.permute.xlu0 %986 }
0x1547   :  { %v989_v55 = vmul.f32 %v1339_v42, %v987_v54 }
0x1549   :  { %991 = vrot.lane.b32.xlu1 %v989_v55, %s1396_s3 }
0x154a   :  { %v432_v9 = vpop.permute.xlu0 %431 }
0x154b   :  { %435 = vst.msk [vmem:[#allocation2] sm:$0x4] %vm434_vm6, %v432_v9 }
0x154e   :  { %v656_v51 = vpop.permute.xlu0 %655 }
0x154f   :  { %659 = vst.msk [vmem:[#allocation2] sm:$0x10] %vm658_vm7, %v656_v51 }
0x1552   :  { %v880_v56 = vpop.permute.xlu0 %879 }
0x1553   :  { %883 = vst.msk [vmem:[#allocation2] sm:$0x40] %vm882_vm8, %v880_v56 }
0x15bb   :  { %v992_v2 = vpop.permute.xlu1 %991 }
0x15bc   :  { %995 = vst.msk [vmem:[#allocation2] sm:$0x80] %vm994_vm9, %v992_v2 }
0x15c3   :  { %v996_v57 = vld [vmem:[#allocation2] sm:$0xff] }
0x15c4   :  { %v997_v58 = vpack.c.bf16 %v996_v57, %v996_v57 }
0x15c6   :  { %1263 = vmatmul.mubr.msk.bf16.vlgmr.msra.gmra.mxu1 %vm63_vm1, %v997_v58 }
0x1686   :  { %v1058_v3 = vpop.f32.mrf.mxu1 }
0x1687   :  { %v1059_v59 = vadd.f32 %v1112_v0, %v1058_v3 }
0x1688   :  { %v1264_v60 = vpop.f32.mrf.mxu1 }
0x1689   :  { %v1065_v5 = vsel %vm1064_vm10, %v1059_v59, -inf }
0x168a   :  { %1066 = vmax.xlane.f32.xlu0 %v1065_v5  ;;  %v1061_v61 = vpop.f32.mrf.mxu1 }
0x168c   :  { %v1265_v6 = vpop.f32.mrf.mxu1 }
0x1713   :  { %v1067_v62 = vpop.xlane.xlu0 %1066 }
0x1714   :  { %v1068_v63 = vsub.f32 %v1059_v59, %v1067_v62 }
0x1716   :  { %v1069_v1 = vmul.f32 1.442695, %v1068_v63 }
0x1718   :  { %1342 = vpow2.f32 %v1069_v1 }
0x1725   :  { %v1343_v4 = vpop.eup %1342 }
0x1726   :  { %v1071_v7 = vsel %vm1064_vm10, %v1343_v4, 0.0 }
0x1727   :  { %1072 = vadd.xlane.f32.xlu1 %v1071_v7 }
0x17b0   :  { %v1073_v8 = vpop.xlane.xlu1 %1072 }
0x17b1   :  { %1344 = vlog2.f32 %v1073_v8 }
0x17be   :  { %v1345_v10 = vpop.eup %1344 }
0x17bf   :  { %v1075_v12 = vmul.f32 0.6931472, %v1345_v10 }
0x17c1   :  { %v1076_v13 = vsub.f32 %v1068_v63, %v1075_v12 }
0x17c3   :  { %1077 = vst.msk [vmem:[#allocation6] sm:$0xff] %vm1064_vm10, %v1076_v13 }
0x17c4   :  { %1377 = shalt.err (!%p1374_p9)
}
0x17c5   :  { %1087 = dma.vmem_to_hbm [thread:$0]  %s1085_s15, 128, %s1639_s6, [#allocation5]  }
0x17c6   :  { %1388 = dma.done.wait [#allocation5], 128  }
0x17c7   :  { %1389 = vsyncadd [#allocation5], 4294967168 }
0x17c8   :  { %1091 = vsyncpa [#allocation4], 1 }
0x17c9   :  { %1092 = vsyncpa [#allocation5], 1 }

</bundles_post_ra>
